<compile_context>
chip_gen: v7x
topology: tpu7x:2x2x1
jax: 0.10.0
libtpu: 0.0.40
codegen_flags: <defaults>
</compile_context>

<pallas_src>
import jax
import jax.numpy as jnp
from jax.experimental import pallas as pl
from jax.experimental.pallas import tpu as pltpu

LANE = 128          # TPU lane width (last-dim tiling unit)
SUBLANE_BF16 = 16   # bf16 rows pack 16 per vreg sublane group
SMALL_BATCH = 256   # below this, use a single tight tile (latency path)
BLOCK_CAP = 512     # default max batch tile (per perf review)


def _round_up(n, m):
    return ((n + m - 1) // m) * m


def _classifier_kernel(x_ref, w1_ref, b1_ref, w2_ref, b2_ref, o_ref):
    # x arrives f32; cast to bf16 in-kernel (VPU work hidden under DMA/MXU)
    # instead of materializing a bf16 copy of x in HBM.
    x = x_ref[...].astype(jnp.bfloat16)                       # (TB, D_in)
    h = jnp.dot(x, w1_ref[...], preferred_element_type=jnp.float32)
    h = jnp.maximum(h + b1_ref[...], 0.0)                     # (TB, H) f32
    y = jnp.dot(h.astype(jnp.bfloat16), w2_ref[...],
                preferred_element_type=jnp.float32)           # (TB, C_pad) f32
    o_ref[...] = (y + b2_ref[...]).astype(o_ref.dtype)


def prepare_params(w1, b1, w2, b2):
    """One-time weight prep, hoisted out of the per-call forward path.

    Accepts PyTorch-style parameters with W already transposed to
    (in_features, out_features) and 1-D or 2-D biases. Returns kernel-ready
    arrays: bf16 weights, f32 (1, H)/(1, C_pad) biases, W2/b2 zero-padded along
    the class dim to a multiple of 128 lanes for lane-dense output stores.
    """
    D_in, H = w1.shape
    C = w2.shape[1]
    C_pad = _round_up(C, LANE)

    b1 = jnp.asarray(b1, jnp.float32).reshape(1, H)
    b2 = jnp.asarray(b2, jnp.float32).reshape(1, C)
    w2 = jnp.asarray(w2, jnp.float32)
    if C_pad != C:
        w2 = jnp.pad(w2, ((0, 0), (0, C_pad - C)))
        b2 = jnp.pad(b2, ((0, 0), (0, C_pad - C)))

    return {
        "w1": jnp.asarray(w1, jnp.float32).astype(jnp.bfloat16),  # (D_in, H)
        "b1": b1,                                                  # (1, H) f32
        "w2": w2.astype(jnp.bfloat16),                             # (H, C_pad)
        "b2": b2,                                                  # (1, C_pad) f32
        "num_classes": C,
    }


def classifier_forward(x, params, *, block_cap=BLOCK_CAP, out_dtype=jnp.float32):
    """x: (B, D_in) float32. Returns (B, num_classes) logits (out_dtype)."""
    B, D_in = x.shape
    w1, b1, w2, b2 = params["w1"], params["b1"], params["w2"], params["b2"]
    C = params["num_classes"]
    H = w1.shape[1]
    C_pad = w2.shape[1]
    assert w1.shape[0] == D_in, "input_dim mismatch between x and W1"

    # Adaptive batch tile:
    #  - small B: one tight tile (multiple of 16 rows for bf16 sublane packing)
    #  - large B: big tiles (<= block_cap) but always >= 2 grid steps so the
    #    "parallel" batch axis shards across both TensorCores on v7x.
    rows = _round_up(B, SUBLANE_BF16)
    if rows <= SMALL_BATCH:
        block_b = rows
    else:
        block_b = min(block_cap, _round_up(pl.cdiv(rows, 2), SUBLANE_BF16))
    n_blocks = pl.cdiv(B, block_b)

    # No explicit batch padding of x: the ragged final block is masked by
    # Pallas (partial reads padded, out-of-range stores dropped). Safe because
    # every output row depends only on its own input row.
    out = pl.pallas_call(
        _classifier_kernel,
        out_shape=jax.ShapeDtypeStruct((B, C_pad), out_dtype),
        grid_spec=pltpu.PrefetchScalarGridSpec(
            num_scalar_prefetch=0,
            grid=(n_blocks,),
            in_specs=[
                pl.BlockSpec((block_b, D_in), lambda i: (i, 0)),  # x tile (f32)
                pl.BlockSpec((D_in, H), lambda i: (0, 0)),        # W1 resident
                pl.BlockSpec((1, H), lambda i: (0, 0)),           # b1
                pl.BlockSpec((H, C_pad), lambda i: (0, 0)),       # W2 resident
                pl.BlockSpec((1, C_pad), lambda i: (0, 0)),       # b2
            ],
            out_specs=pl.BlockSpec((block_b, C_pad), lambda i: (i, 0)),
        ),
        compiler_params=pltpu.CompilerParams(
            dimension_semantics=("parallel",)),
    )(x, w1, b1, w2, b2)

    return out[:, :C]


def init_params(key, input_dim, hidden_dim, num_classes):
    # Mimics PyTorch nn.Linear default init (uniform +/- 1/sqrt(fan_in)).
    # Weights stored transposed vs. PyTorch: y = x @ W + b.
    k1, k2, k3, k4 = jax.random.split(key, 4)
    bound1 = 1.0 / jnp.sqrt(input_dim)
    bound2 = 1.0 / jnp.sqrt(hidden_dim)
    w1 = jax.random.uniform(k1, (input_dim, hidden_dim), jnp.float32, -bound1, bound1)
    b1 = jax.random.uniform(k2, (hidden_dim,), jnp.float32, -bound1, bound1)
    w2 = jax.random.uniform(k3, (hidden_dim, num_classes), jnp.float32, -bound2, bound2)
    b2 = jax.random.uniform(k4, (num_classes,), jnp.float32, -bound2, bound2)
    return w1, b1, w2, b2


if __name__ == "__main__":
    input_dim, hidden_dim, num_classes = 512, 256, 10

    key = jax.random.PRNGKey(0)
    kx, kp = jax.random.split(key)
    w1, b1, w2, b2 = init_params(kp, input_dim, hidden_dim, num_classes)
    params = prepare_params(w1, b1, w2, b2)   # one-time weight prep (hoisted)

    # batch=32: exact 32-row tile.  batch=50: exercises the ragged final block
    # (no wrapper-side padding of x; Pallas masks the partial block).
    for batch in (32, 50):
        x = jax.random.normal(jax.random.fold_in(kx, batch),
                              (batch, input_dim), jnp.float32)
        out = jax.block_until_ready(classifier_forward(x, params))

        # Pure-JAX f32 reference (loose tolerance: bf16 MXU inputs, f32 accum).
        ref = jnp.maximum(x @ w1 + b1, 0.0) @ w2 + b2
        assert out.shape == (batch, num_classes), out.shape
        assert jnp.allclose(out, ref, atol=5e-2, rtol=5e-2), \
            float(jnp.max(jnp.abs(out - ref)))

    print("KERNEL_OK")
</pallas_src>

<mosaic_0001>
module attributes {stable_mosaic.version = 11 : i64} {
  func.func @_classifier_kernel(%arg0: i32, %arg1: memref<32x512xf32, #tpu.memory_space<vmem>>, %arg2: memref<512x256xbf16, #tpu.memory_space<vmem>>, %arg3: memref<1x256xf32, #tpu.memory_space<vmem>>, %arg4: memref<256x128xbf16, #tpu.memory_space<vmem>>, %arg5: memref<1x128xf32, #tpu.memory_space<vmem>>, %arg6: memref<32x128xf32, #tpu.memory_space<vmem>>) attributes {dimension_semantics = [#tpu.dimension_semantics<parallel>], iteration_bounds = array<i64: 1>, scalar_prefetch = 0 : i64, scratch_operands = 0 : i64, tpu.core_type = #tpu.core_type<tc>, window_params = [{transform_indices = @transform_0, window_bounds = array<i64: 32, 512>}, {pipeline_mode = #tpu.pipeline_mode<synchronous>, transform_indices = @transform_1, window_bounds = array<i64: 512, 256>}, {pipeline_mode = #tpu.pipeline_mode<synchronous>, transform_indices = @transform_2, window_bounds = array<i64: 1, 256>}, {pipeline_mode = #tpu.pipeline_mode<synchronous>, transform_indices = @transform_3, window_bounds = array<i64: 256, 128>}, {pipeline_mode = #tpu.pipeline_mode<synchronous>, transform_indices = @transform_4, window_bounds = array<i64: 1, 128>}, {transform_indices = @transform_5, window_bounds = array<i64: 32, 128>}]} {
    %c0 = arith.constant 0 : index
    %c0_0 = arith.constant 0 : index
    %0 = vector.load %arg1[%c0, %c0_0] : memref<32x512xf32, #tpu.memory_space<vmem>>, vector<32x512xf32>
    %1 = arith.truncf %0 : vector<32x512xf32> to vector<32x512xbf16>
    %c0_1 = arith.constant 0 : index
    %c0_2 = arith.constant 0 : index
    %2 = vector.load %arg2[%c0_1, %c0_2] : memref<512x256xbf16, #tpu.memory_space<vmem>>, vector<512x256xbf16>
    %cst = arith.constant dense<0.000000e+00> : vector<32x256xf32>
    %3 = tpu.matmul %1, %2, %cst {dimension_numbers = #tpu.dot_dimension_numbers<[1], [0], [0], [1], [0, 0, 1, 1], [], []>} : vector<32x512xbf16>, vector<512x256xbf16>, vector<32x256xf32> -> vector<32x256xf32>
    %c0_3 = arith.constant 0 : index
    %c0_4 = arith.constant 0 : index
    %4 = vector.load %arg3[%c0_3, %c0_4] : memref<1x256xf32, #tpu.memory_space<vmem>>, vector<1x256xf32>
    %5 = vector.broadcast %4 : vector<1x256xf32> to vector<32x256xf32>
    %6 = arith.addf %3, %5 : vector<32x256xf32>
    %cst_5 = arith.constant 0.000000e+00 : f32
    %7 = vector.broadcast %cst_5 : f32 to vector<32x256xf32>
    %8 = arith.maximumf %6, %7 : vector<32x256xf32>
    %9 = arith.truncf %8 : vector<32x256xf32> to vector<32x256xbf16>
    %c0_6 = arith.constant 0 : index
    %c0_7 = arith.constant 0 : index
    %10 = vector.load %arg4[%c0_6, %c0_7] : memref<256x128xbf16, #tpu.memory_space<vmem>>, vector<256x128xbf16>
    %cst_8 = arith.constant dense<0.000000e+00> : vector<32x128xf32>
    %11 = tpu.matmul %9, %10, %cst_8 {dimension_numbers = #tpu.dot_dimension_numbers<[1], [0], [0], [1], [0, 0, 1, 1], [], []>} : vector<32x256xbf16>, vector<256x128xbf16>, vector<32x128xf32> -> vector<32x128xf32>
    %c0_9 = arith.constant 0 : index
    %c0_10 = arith.constant 0 : index
    %12 = vector.load %arg5[%c0_9, %c0_10] : memref<1x128xf32, #tpu.memory_space<vmem>>, vector<1x128xf32>
    %13 = vector.broadcast %12 : vector<1x128xf32> to vector<32x128xf32>
    %14 = arith.addf %11, %13 : vector<32x128xf32>
    %c0_11 = arith.constant 0 : index
    %c0_12 = arith.constant 0 : index
    %15 = vector.load %arg6[%c0_11, %c0_12] : memref<32x128xf32, #tpu.memory_space<vmem>>, vector<32x128xf32>
    tpu.vector_store %arg6[%c0_11, %c0_12], %14 {strides = array<i32>} : memref<32x128xf32, #tpu.memory_space<vmem>>, vector<32x128xf32>,
    return
  }
  func.func @transform_0(%arg0: i32) -> (i32, i32) {
    %c0_i32 = arith.constant 0 : i32
    %c0_i32_0 = arith.constant 0 : i32
    return %arg0, %c0_i32 : i32, i32
  }
  func.func @transform_1(%arg0: i32) -> (i32, i32) {
    %c0_i32 = arith.constant 0 : i32
    %c0_i32_0 = arith.constant 0 : i32
    %c0_i32_1 = arith.constant 0 : i32
    return %c0_i32, %c0_i32_0 : i32, i32
  }
  func.func @transform_2(%arg0: i32) -> (i32, i32) {
    %c0_i32 = arith.constant 0 : i32
    %c0_i32_0 = arith.constant 0 : i32
    %c0_i32_1 = arith.constant 0 : i32
    return %c0_i32, %c0_i32_0 : i32, i32
  }
  func.func @transform_3(%arg0: i32) -> (i32, i32) {
    %c0_i32 = arith.constant 0 : i32
    %c0_i32_0 = arith.constant 0 : i32
    %c0_i32_1 = arith.constant 0 : i32
    return %c0_i32, %c0_i32_0 : i32, i32
  }
  func.func @transform_4(%arg0: i32) -> (i32, i32) {
    %c0_i32 = arith.constant 0 : i32
    %c0_i32_0 = arith.constant 0 : i32
    %c0_i32_1 = arith.constant 0 : i32
    return %c0_i32, %c0_i32_0 : i32, i32
  }
  func.func @transform_5(%arg0: i32) -> (i32, i32) {
    %c0_i32 = arith.constant 0 : i32
    %c0_i32_0 = arith.constant 0 : i32
    return %arg0, %c0_i32 : i32, i32
  }
}

</mosaic_0001>

<bundles_post_ra>
// kernel: tpu_custom_call.1
= control target key start
LH: loop header
LB: loop body
LE: loop exit
PB: predicated region body
PF: predicated region fallthrough
CT: control target
= control target key end

     0   :  { %10 = vsyncpa [#allocation3], 0  ;;  %s1264_s0 = inlined_call_operand.hbm [shape: f32[32,512], index: 0, kind: input, shape index: {}]   ;;  %s1265_s1 = inlined_call_operand.hbm [shape: bf16[512,256], index: 1, kind: input, shape index: {}]   ;;  %s1266_s2 = inlined_call_operand.vmem [shape: f32[1,256], index: 2, kind: input, shape index: {}]   ;;  %s1267_s3 = inlined_call_operand.hbm [shape: bf16[256,128], index: 3, kind: input, shape index: {}]   ;;  %s1268_s4 = inlined_call_operand.vmem [shape: f32[1,128], index: 4, kind: input, shape index: {}]   ;;  %s1269_s5 = inlined_call_operand.hbm [shape: f32[32,128], index: 5, kind: output, shape index: {}]  }
   0x1   :  { %11 = vsyncpa [#allocation6], 0 }
   0x2   :  { %12 = vsyncpa [#allocation4], 0  ;;  %s1164_s18 = smov [#allocation5]   ;;  %s1070_s22 = scalar_lea.hbm %s1265_s1, 8192 }
   0x3   :  { %s30_s19 = sshll.u32 %s1164_s18, 4  ;;  %p1071_p0 = scmp.ne.s32.totalorder %s1265_s1, %s1070_s22  ;;  %s31_s19 = int_to_ptr.vmem [resolvable:$true] %s30_s19 }
   0x4   :  { %p1074_p1 = scmp.lt.u32.totalorder %s1070_s22, %s1265_s1 }
   0x6   :  { %p1076_p2 = pnand %p1074_p1, %p1071_p0 }
   0x8   :  { %1079 = shalt.err (!%p1076_p2)
}
   0x9   :  { %s1080_s27 = scalar_lea.vmem %s31_s19, 8192  ;;  %p1085_p4 = scmp.lt.s32.totalorder %s31_s19, %s31_s19 }
   0xa   :  { %p1081_p3 = scmp.ne.s32.totalorder %s31_s19, %s1080_s27  ;;  %p1086_p5 = scmp.lt.s32.totalorder %s1080_s27, %s1080_s27 }
   0xc   :  { %p1087_p6 = por %p1086_p5, %p1085_p4 }
   0xe   :  { %p1088_p7 = pnand %p1087_p6, %p1081_p3 }
  0x10   :  { %1091 = shalt.err (!%p1088_p7)
}
  0x11   :  { %s1165_s28 = smov 128   ;;  %s1166_s29 = smov 8  }
  0x12   :  { %36 = dma.hbm_to_vmem [thread:$0]  %s1265_s1, 8192, %s31_s19, [#allocation6], %s1165_s28, %s1165_s28, %s1166_s29  }
  0x13   :  { %s1167_s7 = smov [#allocation2]   ;;  %s1092_s11 = scalar_lea.hbm %s1264_s0, 2048 }
  0x14   :  { %s18_s8 = sshll.u32 %s1167_s7, 4  ;;  %p1093_p8 = scmp.ne.s32.totalorder %s1264_s0, %s1092_s11  ;;  %s19_s8 = int_to_ptr.vmem [resolvable:$true] %s18_s8 }
  0x15   :  { %p1096_p9 = scmp.lt.u32.totalorder %s1092_s11, %s1264_s0 }
  0x17   :  { %p1098_p10 = pnand %p1096_p9, %p1093_p8 }
  0x19   :  { %1101 = shalt.err (!%p1098_p10)
}
  0x1a   :  { %s1102_s16 = scalar_lea.vmem %s19_s8, 2048  ;;  %p1107_p12 = scmp.lt.s32.totalorder %s19_s8, %s19_s8 }
  0x1b   :  { %p1103_p11 = scmp.ne.s32.totalorder %s19_s8, %s1102_s16  ;;  %p1108_p13 = scmp.lt.s32.totalorder %s1102_s16, %s1102_s16 }
  0x1d   :  { %p1109_p0 = por %p1108_p13, %p1107_p12 }
  0x1f   :  { %p1110_p1 = pnand %p1109_p0, %p1103_p11 }
  0x21   :  { %1113 = shalt.err (!%p1110_p1)
}
  0x22   :  { %s1168_s1 = smov 512   ;;  %s1169_s17 = smov 32  }
  0x23   :  { %24 = dma.hbm_to_vmem [thread:$0]  %s1264_s0, 2048, %s19_s8, [#allocation3], %s1168_s1, %s1168_s1, %s1169_s17  }
  0x24   :  { %s1170_s20 = smov [#allocation7]   ;;  %s1114_s24 = scalar_lea.hbm %s1267_s3, 2048 }
  0x25   :  { %s44_s21 = sshll.u32 %s1170_s20, 4  ;;  %p1115_p2 = scmp.ne.s32.totalorder %s1267_s3, %s1114_s24  ;;  %s45_s21 = int_to_ptr.vmem [resolvable:$true] %s44_s21 }
  0x26   :  { %p1118_p3 = scmp.lt.u32.totalorder %s1114_s24, %s1267_s3 }
  0x28   :  { %p1120_p4 = pnand %p1118_p3, %p1115_p2 }
  0x2a   :  { %1123 = shalt.err (!%p1120_p4)
}
  0x2b   :  { %s1124_s6 = scalar_lea.vmem %s45_s21, 2048  ;;  %p1129_p6 = scmp.lt.s32.totalorder %s45_s21, %s45_s21 }
  0x2c   :  { %p1125_p5 = scmp.ne.s32.totalorder %s45_s21, %s1124_s6  ;;  %p1130_p7 = scmp.lt.s32.totalorder %s1124_s6, %s1124_s6 }
  0x2e   :  { %p1131_p8 = por %p1130_p7, %p1129_p6 }
  0x30   :  { %p1132_p9 = pnand %p1131_p8, %p1125_p5 }
  0x32   :  { %1135 = shalt.err (!%p1132_p9)
}
  0x33   :  { %s1171_s0 = smov 64   ;;  %s1172_s7 = smov 4  }
  0x34   :  { %50 = dma.hbm_to_vmem [thread:$0]  %s1267_s3, 2048, %s45_s21, [#allocation6], %s1171_s0, %s1171_s0, %s1172_s7  }
  0x35   :  { %1158 = dma.done.wait [#allocation3], 2048  }
  0x36   :  { %1159 = vsyncadd [#allocation3], 4294965248 }
  0x37   :  { %1160 = dma.done.wait [#allocation6], 10240  }
  0x38   :  { %1161 = vsyncadd [#allocation6], 4294957056  ;;  %v958_v0 = vld [vmem:[#allocation5 + $0x4] ss:$8 sps:$4 sm:$0xff]   ;;  %v962_v2 = vld [vmem:[#allocation5] ss:$8 sps:$4 sm:$0xff]  }
  0x39   :  { %v960_v1 = vld [vmem:[#allocation5 + $0x104] ss:$8 sps:$4 sm:$0xff]   ;;  %483 = vmatprep.subr.bf16.mxu1 %v958_v0  ;;  %v963_v3 = vld [vmem:[#allocation5 + $0x100] ss:$8 sps:$4 sm:$0xff]   ;;  %v964_v4 = vld [vmem:[#allocation5 + $0x14] ss:$8 sps:$4 sm:$0xff]  }
  0x3a   :  { %536 = vmatprep.subr.bf16.mxu0 %v960_v1  ;;  %484 = vmatpush1.bf16.msra.mxu1 %v962_v2  ;;  %v966_v5 = vld [vmem:[#allocation5 + $0x114] ss:$8 sps:$4 sm:$0xff]   ;;  %v968_v6 = vld [vmem:[#allocation5 + $0x10] ss:$8 sps:$4 sm:$0xff]   ;;  %v970_v8 = vld [vmem:[#allocation5 + $0x24] ss:$8 sps:$4 sm:$0xff]  }
  0x3b   :  { %537 = vmatpush1.bf16.msra.mxu0 %v963_v3  ;;  %485 = vmatprep.subr.bf16.mxu1 %v964_v4  ;;  %v969_v7 = vld [vmem:[#allocation5 + $0x110] ss:$8 sps:$4 sm:$0xff]   ;;  %v972_v9 = vld [vmem:[#allocation5 + $0x124] ss:$8 sps:$4 sm:$0xff]   ;;  %v974_v10 = vld [vmem:[#allocation5 + $0x20] ss:$8 sps:$4 sm:$0xff]  }
  0x3c   :  { %538 = vmatprep.subr.bf16.mxu0 %v966_v5  ;;  %v975_v11 = vld [vmem:[#allocation5 + $0x120] ss:$8 sps:$4 sm:$0xff]   ;;  %v976_v12 = vld [vmem:[#allocation5 + $0x34] ss:$8 sps:$4 sm:$0xff]   ;;  %v980_v14 = vld [vmem:[#allocation5 + $0x30] ss:$8 sps:$4 sm:$0xff]  }
  0x3d   :  { %v978_v13 = vld [vmem:[#allocation5 + $0x134] ss:$8 sps:$4 sm:$0xff]   ;;  %v981_v15 = vld [vmem:[#allocation5 + $0x130] ss:$8 sps:$4 sm:$0xff]   ;;  %v982_v16 = vld [vmem:[#allocation5 + $0x44] ss:$8 sps:$4 sm:$0xff]  }
  0x3e   :  { %486 = vmatpush1.bf16.msra.mxu1 %v968_v6  ;;  %v984_v17 = vld [vmem:[#allocation5 + $0x144] ss:$8 sps:$4 sm:$0xff]   ;;  %v986_v18 = vld [vmem:[#allocation5 + $0x40] ss:$8 sps:$4 sm:$0xff]   ;;  %v988_v20 = vld [vmem:[#allocation5 + $0x54] ss:$8 sps:$4 sm:$0xff]  }
  0x3f   :  { %539 = vmatpush1.bf16.msra.mxu0 %v969_v7  ;;  %487 = vmatprep.subr.bf16.mxu1 %v970_v8  ;;  %v987_v19 = vld [vmem:[#allocation5 + $0x140] ss:$8 sps:$4 sm:$0xff]   ;;  %v990_v21 = vld [vmem:[#allocation5 + $0x154] ss:$8 sps:$4 sm:$0xff]   ;;  %v992_v22 = vld [vmem:[#allocation5 + $0x50] ss:$8 sps:$4 sm:$0xff]  }
  0x40   :  { %540 = vmatprep.subr.bf16.mxu0 %v972_v9  ;;  %v993_v23 = vld [vmem:[#allocation5 + $0x150] ss:$8 sps:$4 sm:$0xff]   ;;  %v994_v24 = vld [vmem:[#allocation5 + $0x64] ss:$8 sps:$4 sm:$0xff]   ;;  %v998_v26 = vld [vmem:[#allocation5 + $0x60] ss:$8 sps:$4 sm:$0xff]  }
  0x41   :  { %v996_v25 = vld [vmem:[#allocation5 + $0x164] ss:$8 sps:$4 sm:$0xff]   ;;  %v999_v27 = vld [vmem:[#allocation5 + $0x160] ss:$8 sps:$4 sm:$0xff]   ;;  %v1000_v28 = vld [vmem:[#allocation5 + $0x74] ss:$8 sps:$4 sm:$0xff]  }
  0x42   :  { %488 = vmatpush1.bf16.msra.mxu1 %v974_v10  ;;  %v1002_v29 = vld [vmem:[#allocation5 + $0x174] ss:$8 sps:$4 sm:$0xff]   ;;  %v1004_v30 = vld [vmem:[#allocation5 + $0x70] ss:$8 sps:$4 sm:$0xff]   ;;  %v1006_v32 = vld [vmem:[#allocation5 + $0x84] ss:$8 sps:$4 sm:$0xff]  }
  0x43   :  { %541 = vmatpush1.bf16.msra.mxu0 %v975_v11  ;;  %489 = vmatprep.subr.bf16.mxu1 %v976_v12  ;;  %v1005_v31 = vld [vmem:[#allocation5 + $0x170] ss:$8 sps:$4 sm:$0xff]   ;;  %v1008_v33 = vld [vmem:[#allocation5 + $0x184] ss:$8 sps:$4 sm:$0xff]   ;;  %v1010_v34 = vld [vmem:[#allocation5 + $0x80] ss:$8 sps:$4 sm:$0xff]  }
  0x44   :  { %542 = vmatprep.subr.bf16.mxu0 %v978_v13  ;;  %v1011_v35 = vld [vmem:[#allocation5 + $0x180] ss:$8 sps:$4 sm:$0xff]   ;;  %v1012_v36 = vld [vmem:[#allocation5 + $0x94] ss:$8 sps:$4 sm:$0xff]   ;;  %v1016_v38 = vld [vmem:[#allocation5 + $0x90] ss:$8 sps:$4 sm:$0xff]  }
  0x45   :  { %v1014_v37 = vld [vmem:[#allocation5 + $0x194] ss:$8 sps:$4 sm:$0xff]   ;;  %v1017_v39 = vld [vmem:[#allocation5 + $0x190] ss:$8 sps:$4 sm:$0xff]   ;;  %v1018_v40 = vld [vmem:[#allocation5 + $0xa4] ss:$8 sps:$4 sm:$0xff]  }
  0x46   :  { %490 = vmatpush1.bf16.msra.mxu1 %v980_v14  ;;  %v1020_v41 = vld [vmem:[#allocation5 + $0x1a4] ss:$8 sps:$4 sm:$0xff]   ;;  %v1022_v42 = vld [vmem:[#allocation5 + $0xa0] ss:$8 sps:$4 sm:$0xff]   ;;  %v1024_v44 = vld [vmem:[#allocation5 + $0xb4] ss:$8 sps:$4 sm:$0xff]  }
  0x47   :  { %543 = vmatpush1.bf16.msra.mxu0 %v981_v15  ;;  %491 = vmatprep.subr.bf16.mxu1 %v982_v16  ;;  %v1023_v43 = vld [vmem:[#allocation5 + $0x1a0] ss:$8 sps:$4 sm:$0xff]   ;;  %v1026_v45 = vld [vmem:[#allocation5 + $0x1b4] ss:$8 sps:$4 sm:$0xff]   ;;  %v1028_v50 = vld [vmem:[#allocation5 + $0xb0] ss:$8 sps:$4 sm:$0xff]  }
  0x48   :  { %544 = vmatprep.subr.bf16.mxu0 %v984_v17  ;;  %v64_v46 = vld [vmem:[#allocation2 + $0x8] sm:$0xff]  ;;  %v66_v48 = vld [vmem:[#allocation2 + $0x18] sm:$0xff]  ;;  %v63_v6 = vld [vmem:[#allocation2] sm:$0xff]  ;;  %s1173_s12 = smov [#allocation8]  }
  0x49   :  { %v68_v47 = vld [vmem:[#allocation2 + $0x28] sm:$0xff]  ;;  %v70_v49 = vld [vmem:[#allocation2 + $0x38] sm:$0xff]  ;;  %v67_v7 = vld [vmem:[#allocation2 + $0x20] sm:$0xff]  ;;  %s794_s13 = sshll.u32 %s1173_s12, 4  ;;  %s795_s13 = int_to_ptr.vmem [resolvable:$true] %s794_s13 }
  0x4a   :  { %492 = vmatpush1.bf16.msra.mxu1 %v986_v18  ;;  %v1029_v51 = vld [vmem:[#allocation5 + $0x1b0] ss:$8 sps:$4 sm:$0xff]   ;;  %v80_v52 = vpack.c.bf16 %v68_v47, %v64_v46  ;;  %v82_v53 = vpack.c.bf16 %v70_v49, %v66_v48  ;;  %v1030_v54 = vld [vmem:[#allocation5 + $0xc4] ss:$8 sps:$4 sm:$0xff]   ;;  %v1034_v56 = vld [vmem:[#allocation5 + $0xc0] ss:$8 sps:$4 sm:$0xff]   ;;  %v79_v15 = vpack.c.bf16 %v67_v7, %v63_v6  ;;  %p1141_p11 = scmp.lt.s32.totalorder %s795_s13, %s795_s13 }
  0x4b   :  { %545 = vmatpush1.bf16.msra.mxu0 %v987_v19  ;;  %493 = vmatprep.subr.bf16.mxu1 %v988_v20  ;;  %v1032_v55 = vld [vmem:[#allocation5 + $0x1c4] ss:$8 sps:$4 sm:$0xff]   ;;  %v1035_v57 = vld [vmem:[#allocation5 + $0x1c0] ss:$8 sps:$4 sm:$0xff]   ;;  %v1036_v58 = vld [vmem:[#allocation5 + $0xd4] ss:$8 sps:$4 sm:$0xff]  }
  0x4c   :  { %546 = vmatprep.subr.bf16.mxu0 %v990_v21  ;;  %515 = vmatprep.mubr.bf16.mxu1 %v80_v52  ;;  %v1038_v59 = vld [vmem:[#allocation5 + $0x1d4] ss:$8 sps:$4 sm:$0xff]   ;;  %v1040_v60 = vld [vmem:[#allocation5 + $0xd0] ss:$8 sps:$4 sm:$0xff]   ;;  %v1042_v62 = vld [vmem:[#allocation5 + $0xe4] ss:$8 sps:$4 sm:$0xff]  }
  0x4d   :  { %568 = vmatprep.mubr.bf16.mxu0 %v82_v53  ;;  %v1041_v61 = vld [vmem:[#allocation5 + $0x1d0] ss:$8 sps:$4 sm:$0xff]   ;;  %v1044_v63 = vld [vmem:[#allocation5 + $0x1e4] ss:$8 sps:$4 sm:$0xff]   ;;  %v1046_v0 = vld [vmem:[#allocation5 + $0xe0] ss:$8 sps:$4 sm:$0xff]  }
  0x4e   :  { %494 = vmatpush1.bf16.msra.mxu1 %v992_v22  ;;  %v1047_v1 = vld [vmem:[#allocation5 + $0x1e0] ss:$8 sps:$4 sm:$0xff]   ;;  %v1048_v2 = vld [vmem:[#allocation5 + $0xf4] ss:$8 sps:$4 sm:$0xff]   ;;  %v1052_v4 = vld [vmem:[#allocation5 + $0xf0] ss:$8 sps:$4 sm:$0xff]  }
  0x4f   :  { %547 = vmatpush1.bf16.msra.mxu0 %v993_v23  ;;  %495 = vmatprep.subr.bf16.mxu1 %v994_v24  ;;  %v1050_v3 = vld [vmem:[#allocation5 + $0x1f4] ss:$8 sps:$4 sm:$0xff]   ;;  %v1053_v5 = vld [vmem:[#allocation5 + $0x1f0] ss:$8 sps:$4 sm:$0xff]   ;;  %v72_v10 = vld [vmem:[#allocation2 + $0x48] sm:$0xff] }
  0x50   :  { %548 = vmatprep.subr.bf16.mxu0 %v996_v25  ;;  %v65_v8 = vld [vmem:[#allocation2 + $0x10] sm:$0xff]  ;;  %v76_v11 = vld [vmem:[#allocation2 + $0x68] sm:$0xff]  ;;  %v74_v12 = vld [vmem:[#allocation2 + $0x58] sm:$0xff] }
  0x51   :  { %v69_v9 = vld [vmem:[#allocation2 + $0x30] sm:$0xff]  ;;  %v78_v13 = vld [vmem:[#allocation2 + $0x78] sm:$0xff]  ;;  %v1054_v14 = vld [vmem:[#allocation7 + $0x40] sm:$0xff]   ;;  %v84_v17 = vpack.c.bf16 %v76_v11, %v72_v10 }
  0x52   :  { %496 = vmatpush1.bf16.msra.mxu1 %v998_v26  ;;  %v81_v16 = vpack.c.bf16 %v69_v9, %v65_v8  ;;  %v86_v18 = vpack.c.bf16 %v78_v13, %v74_v12  ;;  %v1055_v19 = vld [vmem:[#allocation7] sm:$0xff]   ;;  %v1056_v20 = vld [vmem:[#allocation7 + $0x48] sm:$0xff]   ;;  %v73_v23 = vld [vmem:[#allocation2 + $0x50] sm:$0xff] }
  0x53   :  { %549 = vmatpush1.bf16.msra.mxu0 %v999_v27  ;;  %497 = vmatprep.subr.bf16.mxu1 %v1000_v28  ;;  %v71_v21 = vld [vmem:[#allocation2 + $0x40] sm:$0xff]  ;;  %v77_v24 = vld [vmem:[#allocation2 + $0x70] sm:$0xff]  ;;  %v1057_v25 = vld [vmem:[#allocation7 + $0x8] sm:$0xff]  }
  0x54   :  { %550 = vmatprep.subr.bf16.mxu0 %v1002_v29  ;;  %v75_v22 = vld [vmem:[#allocation2 + $0x60] sm:$0xff]  ;;  %v1058_v26 = vld [vmem:[#allocation7 + $0x50] sm:$0xff]   ;;  %v85_v28 = vpack.c.bf16 %v77_v24, %v73_v23 }
  0x55   :  { %v83_v27 = vpack.c.bf16 %v75_v22, %v71_v21  ;;  %v1059_v29 = vld [vmem:[#allocation7 + $0x10] sm:$0xff]  }
  0x56   :  { %498 = vmatpush1.bf16.msra.mxu1 %v1004_v30  ;;  %v1060_v30 = vld [vmem:[#allocation7 + $0x58] sm:$0xff]  }
  0x57   :  { %551 = vmatpush1.bf16.msra.mxu0 %v1005_v31  ;;  %499 = vmatprep.subr.bf16.mxu1 %v1006_v32  ;;  %v1061_v31 = vld [vmem:[#allocation7 + $0x18] sm:$0xff]   ;;  %v1062_v32 = vld [vmem:[#allocation7 + $0x60] sm:$0xff]  }
  0x58   :  { %552 = vmatprep.subr.bf16.mxu0 %v1008_v33  ;;  %v1063_v33 = vld [vmem:[#allocation7 + $0x20] sm:$0xff]  }
  0x5a   :  { %500 = vmatpush1.bf16.msra.mxu1 %v1010_v34  ;;  %v1064_v34 = vld [vmem:[#allocation7 + $0x68] sm:$0xff]  }
  0x5b   :  { %553 = vmatpush1.bf16.msra.mxu0 %v1011_v35  ;;  %501 = vmatprep.subr.bf16.mxu1 %v1012_v36  ;;  %v1065_v35 = vld [vmem:[#allocation7 + $0x28] sm:$0xff]   ;;  %v1066_v36 = vld [vmem:[#allocation7 + $0x70] sm:$0xff]  }
  0x5c   :  { %554 = vmatprep.subr.bf16.mxu0 %v1014_v37  ;;  %v1067_v37 = vld [vmem:[#allocation7 + $0x30] sm:$0xff]  }
  0x5e   :  { %502 = vmatpush1.bf16.msra.mxu1 %v1016_v38  ;;  %v1068_v38 = vld [vmem:[#allocation7 + $0x78] sm:$0xff]  }
  0x5f   :  { %555 = vmatpush1.bf16.msra.mxu0 %v1017_v39  ;;  %503 = vmatprep.subr.bf16.mxu1 %v1018_v40  ;;  %v1069_v39 = vld [vmem:[#allocation7 + $0x38] sm:$0xff]   ;;  %v153_v40 = vlaneseq }
  0x60   :  { %556 = vmatprep.subr.bf16.mxu0 %v1020_v41 }
  0x61   :  { %v154_v41 = vshrl.u32 %v153_v40, 7 }
  0x62   :  { %504 = vmatpush1.bf16.msra.mxu1 %v1022_v42 }
  0x63   :  { %557 = vmatpush1.bf16.msra.mxu0 %v1023_v43  ;;  %505 = vmatprep.subr.bf16.mxu1 %v1024_v44  ;;  %v155_v42 = vsub.s32 0, %v154_v41  ;;  %v151_v43 = vld [vmem:[%s1266_s2] sm:$0x3]  ;;  %v159_v44 = vsub.s32 1, %v154_v41 }
  0x64   :  { %558 = vmatprep.subr.bf16.mxu0 %v1026_v45 }
  0x65   :  { %v156_v45 = vrot.slane %v151_v43, %v155_v42  ;;  %v160_v46 = vrot.slane %v151_v43, %v159_v44 }
  0x66   :  { %506 = vmatpush1.bf16.msra.mxu1 %v1028_v50 }
  0x67   :  { %559 = vmatpush1.bf16.msra.mxu0 %v1029_v51  ;;  %507 = vmatprep.subr.bf16.mxu1 %v1030_v54 }
  0x68   :  { %560 = vmatprep.subr.bf16.mxu0 %v1032_v55 }
  0x6a   :  { %508 = vmatpush1.bf16.msra.mxu1 %v1034_v56 }
  0x6b   :  { %561 = vmatpush1.bf16.msra.mxu0 %v1035_v57  ;;  %509 = vmatprep.subr.bf16.mxu1 %v1036_v58 }
  0x6c   :  { %562 = vmatprep.subr.bf16.mxu0 %v1038_v59 }
  0x6e   :  { %510 = vmatpush1.bf16.msra.mxu1 %v1040_v60 }
  0x6f   :  { %563 = vmatpush1.bf16.msra.mxu0 %v1041_v61  ;;  %511 = vmatprep.subr.bf16.mxu1 %v1042_v62 }
  0x70   :  { %564 = vmatprep.subr.bf16.mxu0 %v1044_v63 }
  0x72   :  { %512 = vmatpush1.bf16.msra.mxu1 %v1046_v0 }
  0x73   :  { %565 = vmatpush1.bf16.msra.mxu0 %v1047_v1  ;;  %513 = vmatprep.subr.bf16.mxu1 %v1048_v2 }
  0x74   :  { %566 = vmatprep.subr.bf16.mxu0 %v1050_v3 }
  0x76   :  { %514 = vmatpush1.bf16.msra.mxu1 %v1052_v4 }
  0x77   :  { %567 = vmatpush1.bf16.msra.mxu0 %v1053_v5  ;;  %916 = vmatprep.subr.bf16.mxu1 %v1054_v14 }
  0x78   :  { %888 = vmatprep.subr.bf16.mxu0 %v1054_v14 }
  0x79   :  { %516 = vmatmul.mubr.bf16.vlgmr.msra.gmra.mrb[0].mxu1 %v79_v15 }
  0x7a   :  { %569 = vmatmul.mubr.bf16.vlgmr.msra.gmra.mrb[0].mxu0 %v81_v16  ;;  %525 = vmatprep.mubr.bf16.mxu1 %v84_v17 }
  0x7b   :  { %578 = vmatprep.mubr.bf16.mxu0 %v86_v18  ;;  %889 = vmatpush3.bf16.msra.mxu0 %v1055_v19 }
  0x7c   :  { %924 = vmatpush3.bf16.msra.mxu1 %v1055_v19  ;;  %890 = vmatprep.subr.bf16.mxu0 %v1056_v20 }
  0x7d   :  { %917 = vmatprep.subr.bf16.mxu1 %v1056_v20 }
  0x7f   :  { %891 = vmatpush3.bf16.msra.mxu0 %v1057_v25 }
  0x80   :  { %925 = vmatpush3.bf16.msra.mxu1 %v1057_v25  ;;  %892 = vmatprep.subr.bf16.mxu0 %v1058_v26 }
  0x81   :  { %918 = vmatprep.subr.bf16.mxu1 %v1058_v26  ;;  %526 = vmatmul.mubr.bf16.gmra.mrb[4].mxu1 %v83_v27 }
  0x82   :  { %579 = vmatmul.mubr.bf16.gmra.mrb[4].mxu0 %v85_v28  ;;  %v871_v28 = vld [vmem:[%s1268_s4] ss:$0 sm:$0xff]  ;;  %s1136_s4 = scalar_lea.vmem %s795_s13, 512 }
  0x83   :  { %893 = vmatpush3.bf16.msra.mxu0 %v1059_v29  ;;  %p1137_p10 = scmp.ne.s32.totalorder %s795_s13, %s1136_s4  ;;  %p1142_p12 = scmp.lt.s32.totalorder %s1136_s4, %s1136_s4 }
  0x84   :  { %926 = vmatpush3.bf16.msra.mxu1 %v1059_v29  ;;  %894 = vmatprep.subr.bf16.mxu0 %v1060_v30 }
  0x85   :  { %919 = vmatprep.subr.bf16.mxu1 %v1060_v30  ;;  %p1143_p13 = por %p1142_p12, %p1141_p11 }
  0x87   :  { %895 = vmatpush3.bf16.msra.mxu0 %v1061_v31  ;;  %p1144_p0 = pnand %p1143_p13, %p1137_p10 }
  0x88   :  { %927 = vmatpush3.bf16.msra.mxu1 %v1061_v31  ;;  %896 = vmatprep.subr.bf16.mxu0 %v1062_v32 }
  0x89   :  { %920 = vmatprep.subr.bf16.mxu1 %v1062_v32 }
  0x8b   :  { %897 = vmatpush3.bf16.msra.mxu0 %v1063_v33 }
  0x8c   :  { %928 = vmatpush3.bf16.msra.mxu1 %v1063_v33  ;;  %898 = vmatprep.subr.bf16.mxu0 %v1064_v34 }
  0x8d   :  { %921 = vmatprep.subr.bf16.mxu1 %v1064_v34 }
  0x8f   :  { %899 = vmatpush3.bf16.msra.mxu0 %v1065_v35 }
  0x90   :  { %929 = vmatpush3.bf16.msra.mxu1 %v1065_v35  ;;  %900 = vmatprep.subr.bf16.mxu0 %v1066_v36 }
  0x91   :  { %922 = vmatprep.subr.bf16.mxu1 %v1066_v36 }
  0x93   :  { %901 = vmatpush3.bf16.msra.mxu0 %v1067_v37 }
  0x94   :  { %930 = vmatpush3.bf16.msra.mxu1 %v1067_v37  ;;  %902 = vmatprep.subr.bf16.mxu0 %v1068_v38 }
  0x95   :  { %923 = vmatprep.subr.bf16.mxu1 %v1068_v38 }
  0x97   :  { %903 = vmatpush3.bf16.msra.mxu0 %v1069_v39 }
  0x98   :  { %931 = vmatpush3.bf16.msra.mxu1 %v1069_v39 }
 0x14c   :  { %v517_v47 = vpop.f32.mrb[0].mxu1 }
 0x14d   :  { %v570_v48 = vpop.f32.mrb[0].mxu0  ;;  %v518_v49 = vadd.f32 %v517_v47, %v156_v45  ;;  %v519_v50 = vpop.f32.mrb[1].mxu1 }
 0x14e   :  { %v572_v51 = vpop.f32.mrb[1].mxu0  ;;  %v520_v52 = vadd.f32 %v519_v50, %v160_v46  ;;  %v521_v53 = vpop.f32.mrb[2].mxu1 }
 0x14f   :  { %v574_v54 = vpop.f32.mrb[2].mxu0  ;;  %v571_v55 = vadd.f32 %v570_v48, %v518_v49  ;;  %v522_v56 = vadd.f32 %v521_v53, %v156_v45  ;;  %v523_v57 = vpop.f32.mrb[3].mxu1 }
 0x150   :  { %v576_v58 = vpop.f32.mrb[3].mxu0  ;;  %v573_v59 = vadd.f32 %v572_v51, %v520_v52  ;;  %v524_v60 = vadd.f32 %v523_v57, %v160_v46 }
 0x151   :  { %v575_v61 = vadd.f32 %v574_v54, %v522_v56  ;;  %v589_v63 = vmax.f32 %v571_v55, 0.0 }
 0x152   :  { %v577_v62 = vadd.f32 %v576_v58, %v524_v60  ;;  %v590_v1 = vmax.f32 %v573_v59, 0.0 }
 0x153   :  { %v591_v0 = vmax.f32 %v575_v61, 0.0 }
 0x154   :  { %v592_v2 = vmax.f32 %v577_v62, 0.0  ;;  %v527_v3 = vpop.f32.mrb[4].mxu1 }
 0x155   :  { %v580_v4 = vpop.f32.mrb[4].mxu0  ;;  %v597_v5 = vpack.c.bf16 %v591_v0, %v589_v63  ;;  %v528_v6 = vadd.f32 %v527_v3, %v156_v45  ;;  %v529_v7 = vpop.f32.mrb[5].mxu1 }
 0x156   :  { %v582_v8 = vpop.f32.mrb[5].mxu0  ;;  %v598_v9 = vpack.c.bf16 %v592_v2, %v590_v1  ;;  %v530_v10 = vadd.f32 %v529_v7, %v160_v46  ;;  %v531_v11 = vpop.f32.mrb[6].mxu1 }
 0x157   :  { %v584_v12 = vpop.f32.mrb[6].mxu0  ;;  %v581_v13 = vadd.f32 %v580_v4, %v528_v6  ;;  %v532_v14 = vadd.f32 %v531_v11, %v156_v45  ;;  %v533_v15 = vpop.f32.mrb[7].mxu1 }
 0x158   :  { %v586_v16 = vpop.f32.mrb[7].mxu0  ;;  %v583_v17 = vadd.f32 %v582_v8, %v530_v10  ;;  %v534_v18 = vadd.f32 %v533_v15, %v160_v46  ;;  %768 = vmatprep.mubr.bf16.mxu0 %v598_v9 }
 0x159   :  { %v585_v19 = vadd.f32 %v584_v12, %v532_v14  ;;  %769 = vmatmul.mubr.bf16.vlgmr.msra.gmra.mrb[8].mxu0 %v597_v5  ;;  %v593_v21 = vmax.f32 %v581_v13, 0.0 }
 0x15a   :  { %v587_v20 = vadd.f32 %v586_v16, %v534_v18  ;;  %v594_v23 = vmax.f32 %v583_v17, 0.0 }
 0x15b   :  { %v595_v22 = vmax.f32 %v585_v19, 0.0 }
 0x15c   :  { %v596_v24 = vmax.f32 %v587_v20, 0.0 }
 0x15d   :  { %v599_v25 = vpack.c.bf16 %v595_v22, %v593_v21 }
 0x15e   :  { %v600_v26 = vpack.c.bf16 %v596_v24, %v594_v23 }
 0x160   :  { %776 = vmatprep.mubr.bf16.mxu1 %v600_v26 }
 0x161   :  { %777 = vmatmul.mubr.bf16.vlgmr.msra.gmra.mrb[8].mxu1 %v599_v25 }
 0x22c   :  { %v904_v27 = vpop.f32.mrb[8].mxu0 }
 0x22d   :  { %v905_v29 = vpop.f32.mrb[9].mxu0 }
 0x22e   :  { %v906_v30 = vadd.f32 %v905_v29, %v904_v27  ;;  %v907_v31 = vpop.f32.mrb[10].mxu0 }
 0x22f   :  { %v908_v32 = vpop.f32.mrb[11].mxu0 }
 0x230   :  { %v771_v33 = vadd.f32 %v906_v30, %v871_v28  ;;  %v909_v34 = vadd.f32 %v908_v32, %v907_v31 }
 0x232   :  { %785 = vst [vmem:[#allocation8] sm:$0xff] %v771_v33  ;;  %v774_v35 = vadd.f32 %v909_v34, %v871_v28 }
 0x234   :  { %786 = vst [vmem:[#allocation8 + $0x8] sm:$0xff] %v774_v35  ;;  %v910_v36 = vpop.f32.mrb[8].mxu1 }
 0x235   :  { %v911_v37 = vpop.f32.mrb[9].mxu1 }
 0x236   :  { %v912_v38 = vadd.f32 %v911_v37, %v910_v36  ;;  %v913_v39 = vpop.f32.mrb[10].mxu1 }
 0x237   :  { %v914_v40 = vpop.f32.mrb[11].mxu1 }
 0x238   :  { %v779_v41 = vadd.f32 %v912_v38, %v871_v28  ;;  %v915_v42 = vadd.f32 %v914_v40, %v913_v39 }
 0x23a   :  { %787 = vst [vmem:[#allocation8 + $0x10] sm:$0xff] %v779_v41  ;;  %v782_v43 = vadd.f32 %v915_v42, %v871_v28 }
 0x23c   :  { %788 = vst [vmem:[#allocation8 + $0x18] sm:$0xff] %v782_v43 }
 0x23d   :  { %1147 = shalt.err (!%p1144_p0)
}
 0x23e   :  { %s1148_s16 = scalar_lea.hbm %s1269_s5, 512 }
 0x23f   :  { %p1149_p1 = scmp.ne.s32.totalorder %s1269_s5, %s1148_s16  ;;  %p1152_p2 = scmp.lt.u32.totalorder %s1148_s16, %s1269_s5 }
 0x241   :  { %p1154_p3 = pnand %p1152_p2, %p1149_p1 }
 0x243   :  { %1157 = shalt.err (!%p1154_p3)
}
 0x244   :  { %800 = dma.vmem_to_hbm [thread:$0]  %s795_s13, 512, %s1269_s5, [#allocation4], %s1165_s28, %s1165_s28, %s1166_s29  }
 0x245   :  { %1162 = dma.done.wait [#allocation4], 512  }
 0x246   :  { %1163 = vsyncadd [#allocation4], 4294966784 }
 0x247   :  { %804 = vsyncpa [#allocation3], 1 }
 0x248   :  { %805 = vsyncpa [#allocation6], 1 }
 0x249   :  { %806 = vsyncpa [#allocation4], 1 }

</bundles_post_ra>
